<compile_context>
chip_gen: v7x
topology: tpu7x:2x2x1
jax: 0.10.0
libtpu: 0.0.40
codegen_flags: <defaults>
</compile_context>

<pallas_src>
import functools
import math

import jax
import jax.numpy as jnp
from jax import lax
from jax.experimental import pallas as pl
from jax.experimental.pallas import tpu as pltpu


# ----------------------------------------------------------------------------
# Kernel: bias-free LayerNorm over the last axis
# ----------------------------------------------------------------------------
def _biasfree_layernorm_kernel(x_ref, w_ref, o_ref, *, eps):
    # x: (TM, C) in input dtype; w: (1, C) f32 (broadcasts over rows)
    x = x_ref[...].astype(jnp.float32)
    w = w_ref[...]
    mu = jnp.mean(x, axis=-1, keepdims=True)
    var = jnp.mean(jnp.square(x - mu), axis=-1, keepdims=True)  # unbiased=False
    y = x * lax.rsqrt(var + eps) * w                            # x NOT centered
    o_ref[...] = y.astype(o_ref.dtype)


def _round_up(a, b):
    return (a + b - 1) // b * b


def _pick_block_rows(M, C, itemsize=4, target_bytes=1 << 20, max_rows=1024):
    """Row-tile size: ~1 MiB f32 blocks, sublane-aligned (8), and capped at
    ceil(M/2) so there are >= 2 grid steps when M allows (pipelining plus
    work for both v7x TensorCores)."""
    rows = max(8, min(max_rows, (target_bytes // max(C * itemsize, 1)) // 8 * 8))
    half = max(8, _round_up((M + 1) // 2, 8))
    return min(rows, half)


def biasfree_layernorm(x, weight, *, eps=1e-5, block_rows=None):
    """y = x / sqrt(var(x, -1, unbiased=False) + eps) * weight, weight: (C,)."""
    orig_shape = x.shape
    C = orig_shape[-1]
    M = int(math.prod(orig_shape[:-1]))
    x2 = x.reshape(M, C)

    tm = block_rows if block_rows is not None else _pick_block_rows(M, C)
    Mp = _round_up(M, tm)
    if Mp != M:
        # Padded rows compute a harmless finite value and are sliced off below.
        x2 = jnp.pad(x2, ((0, Mp - M), (0, 0)))

    out = pl.pallas_call(
        functools.partial(_biasfree_layernorm_kernel, eps=eps),
        out_shape=jax.ShapeDtypeStruct((Mp, C), x.dtype),
        grid=(Mp // tm,),
        in_specs=[pl.BlockSpec((tm, C), lambda i: (i, 0)),
                  pl.BlockSpec((1, C), lambda i: (0, 0))],
        out_specs=pl.BlockSpec((tm, C), lambda i: (i, 0)),
        compiler_params=pltpu.CompilerParams(
            dimension_semantics=("parallel",)),
    )(x2, weight.reshape(1, C).astype(jnp.float32))

    if Mp != M:
        out = out[:M]
    return out.reshape(orig_shape)


# ----------------------------------------------------------------------------
# Pure-JAX reference (mirrors the PyTorch forward)
# ----------------------------------------------------------------------------
def _reference(x, weight, eps=1e-5):
    xf = x.astype(jnp.float32)
    var = jnp.var(xf, axis=-1, keepdims=True)        # ddof=0 == unbiased=False
    return (xf / jnp.sqrt(var + eps) * weight.astype(jnp.float32)).astype(x.dtype)


# ----------------------------------------------------------------------------
if __name__ == "__main__":
    key = jax.random.PRNGKey(0)
    k1, k2, k3, k4, k5, k6 = jax.random.split(key, 6)

    # Main demo: (B, L, C) token tensor with a lane-dense channel count.
    B, L, C = 2, 256, 128
    x = jax.random.normal(k1, (B, L, C), jnp.float32)
    weight = 1.0 + 0.05 * jax.random.normal(k2, (C,), jnp.float32)

    y = jax.jit(biasfree_layernorm)(x, weight)
    jax.block_until_ready(y)

    y_ref = _reference(x, weight)
    assert y.shape == x.shape
    assert bool(jnp.all(jnp.isfinite(y)))
    assert bool(jnp.allclose(y, y_ref, atol=1e-5, rtol=1e-5)), \
        float(jnp.max(jnp.abs(y - y_ref)))

    # Ragged case: C not a multiple of 128 and M not a multiple of the tile
    # (exercises the full-C block + row-padding path).
    x_s = jax.random.normal(k3, (3, 50, 48), jnp.float32)
    w_s = 1.0 + 0.05 * jax.random.normal(k4, (48,), jnp.float32)
    y_s = jax.jit(biasfree_layernorm)(x_s, w_s)
    jax.block_until_ready(y_s)
    assert bool(jnp.allclose(y_s, _reference(x_s, w_s), atol=1e-5, rtol=1e-5))

    # bf16 inputs: stats computed in f32 in-kernel, output stored as bf16.
    x_b = jax.random.normal(k5, (4, 64, 128), jnp.bfloat16)
    w_b = (1.0 + 0.05 * jax.random.normal(k6, (128,), jnp.float32)).astype(jnp.bfloat16)
    y_b = jax.jit(biasfree_layernorm)(x_b, w_b)
    jax.block_until_ready(y_b)
    assert y_b.dtype == jnp.bfloat16
    assert bool(jnp.allclose(y_b.astype(jnp.float32),
                             _reference(x_b, w_b).astype(jnp.float32),
                             atol=2e-2, rtol=2e-2))

    print("KERNEL_OK")
</pallas_src>

<mosaic_0001>
module attributes {stable_mosaic.version = 11 : i64} {
  func.func @_biasfree_layernorm_kernel(%arg0: i32, %arg1: memref<256x128xf32, #tpu.memory_space<vmem>>, %arg2: memref<1x128xf32, #tpu.memory_space<vmem>>, %arg3: memref<256x128xf32, #tpu.memory_space<vmem>>) attributes {dimension_semantics = [#tpu.dimension_semantics<parallel>], iteration_bounds = array<i64: 2>, scalar_prefetch = 0 : i64, scratch_operands = 0 : i64, tpu.core_type = #tpu.core_type<tc>, window_params = [{transform_indices = @transform_0, window_bounds = array<i64: 256, 128>}, {pipeline_mode = #tpu.pipeline_mode<synchronous>, transform_indices = @transform_1, window_bounds = array<i64: 1, 128>}, {transform_indices = @transform_2, window_bounds = array<i64: 256, 128>}]} {
    %c0 = arith.constant 0 : index
    %c0_0 = arith.constant 0 : index
    %0 = vector.load %arg1[%c0, %c0_0] : memref<256x128xf32, #tpu.memory_space<vmem>>, vector<256x128xf32>
    %c0_1 = arith.constant 0 : index
    %c0_2 = arith.constant 0 : index
    %1 = vector.load %arg2[%c0_1, %c0_2] : memref<1x128xf32, #tpu.memory_space<vmem>>, vector<1x128xf32>
    %cst = arith.constant dense<0.000000e+00> : vector<256xf32>
    %2 = vector.multi_reduction <add>, %0, %cst [1] : vector<256x128xf32> to vector<256xf32>
    %3 = vector.shape_cast %2 : vector<256xf32> to vector<256x1xf32>
    %cst_3 = arith.constant 1.280000e+02 : f32
    %4 = vector.broadcast %cst_3 : f32 to vector<256x1xf32>
    %5 = arith.divf %3, %4 : vector<256x1xf32>
    %6 = vector.broadcast %5 : vector<256x1xf32> to vector<256x128xf32>
    %7 = arith.subf %0, %6 : vector<256x128xf32>
    %8 = arith.mulf %7, %7 : vector<256x128xf32>
    %cst_4 = arith.constant dense<0.000000e+00> : vector<256xf32>
    %9 = vector.multi_reduction <add>, %8, %cst_4 [1] : vector<256x128xf32> to vector<256xf32>
    %10 = vector.shape_cast %9 : vector<256xf32> to vector<256x1xf32>
    %cst_5 = arith.constant 1.280000e+02 : f32
    %11 = vector.broadcast %cst_5 : f32 to vector<256x1xf32>
    %12 = arith.divf %10, %11 : vector<256x1xf32>
    %cst_6 = arith.constant 9.99999974E-6 : f32
    %13 = vector.broadcast %cst_6 : f32 to vector<256x1xf32>
    %14 = arith.addf %12, %13 : vector<256x1xf32>
    %15 = math.rsqrt %14 : vector<256x1xf32>
    %16 = vector.broadcast %15 : vector<256x1xf32> to vector<256x128xf32>
    %17 = arith.mulf %0, %16 : vector<256x128xf32>
    %18 = vector.broadcast %1 : vector<1x128xf32> to vector<256x128xf32>
    %19 = arith.mulf %17, %18 : vector<256x128xf32>
    %c0_7 = arith.constant 0 : index
    %c0_8 = arith.constant 0 : index
    %20 = vector.load %arg3[%c0_7, %c0_8] : memref<256x128xf32, #tpu.memory_space<vmem>>, vector<256x128xf32>
    tpu.vector_store %arg3[%c0_7, %c0_8], %19 {strides = array<i32>} : memref<256x128xf32, #tpu.memory_space<vmem>>, vector<256x128xf32>,
    return
  }
  func.func @transform_0(%arg0: i32) -> (i32, i32) {
    %c0_i32 = arith.constant 0 : i32
    %c0_i32_0 = arith.constant 0 : i32
    return %arg0, %c0_i32 : i32, i32
  }
  func.func @transform_1(%arg0: i32) -> (i32, i32) {
    %c0_i32 = arith.constant 0 : i32
    %c0_i32_0 = arith.constant 0 : i32
    %c0_i32_1 = arith.constant 0 : i32
    return %c0_i32, %c0_i32_0 : i32, i32
  }
  func.func @transform_2(%arg0: i32) -> (i32, i32) {
    %c0_i32 = arith.constant 0 : i32
    %c0_i32_0 = arith.constant 0 : i32
    return %arg0, %c0_i32 : i32, i32
  }
}

</mosaic_0001>

<bundles_post_ra>
// kernel: biasfree_layernorm.1
= control target key start
LH: loop header
LB: loop body
LE: loop exit
PB: predicated region body
PF: predicated region fallthrough
CT: control target
= control target key end

     0   :  { %7 = vsyncpa [#allocation3], 0  ;;  %s1389_s0 = inlined_call_operand.hbm [shape: f32[512,128], index: 0, kind: input, shape index: {}]   ;;  %s1390_s1 = inlined_call_operand.vmem [shape: f32[1,128], index: 1, kind: input, shape index: {}]   ;;  %s1391_s2 = inlined_call_operand.hbm [shape: f32[512,128], index: 2, kind: output, shape index: {}]  }
   0x1   :  { %9 = vsyncpa [#allocation3 + $0x1], 0 }
   0x2   :  { %10 = vsyncpa [#allocation4], 0 }
   0x3   :  { %12 = vsyncpa [#allocation4 + $0x1], 0  ;;  %s957_s9 = smov 0   ;;  %s959_s10 = smov 0  }
   0x4   :  { %s961_s11 = smov 0   ;;  %s963_s12 = smov 0  }
   0x5 LB: > { %s978_s13 = sadd.s32 4294967295, %s934_s12   ;;  %s707_s14 = sadd.s32 4294967294, %s934_s12   ;;  %s934_s12 = sphi %s963_s12, %s1404_s12   ;;  %s930_s11 = sphi %s961_s11, %s1403_s11   ;;  %s926_s10 = sphi %s959_s10, %s1402_s10   ;;  %s922_s9 = sphi %s957_s9, %s1401_s9  }
   0x6   : > { %s982_s15 = sadd.s32 1, %s934_s12   ;;  %s25_s16 = sadd.s32 1, %s930_s11 }
   0x7   : > { %s22_s17 = ssub.s32 %s934_s12, %s982_s15  ;;  %p32_p0 = scmp.ne.s32.totalorder %s930_s11, %s926_s10 }
   0x8   : > { %p23_p1 = scmp.eq.s32.totalorder %s22_s17, 0  ;;  %p33_p2 = scmp.eq.s32.totalorder %s934_s12, 0 }
   0x9   : > { %p38_p3 = scmp.ne.s32.totalorder %s926_s10, %s922_s9  ;;  %p39_p4 = scmp.eq.s32.totalorder %s978_s13, 0 }
   0xa   : > { %s994_s18 = scalar_select %p23_p1, %s930_s11, %s25_s16  }
   0xb   : > { %p996_p5 = por %p33_p2, %p32_p0  ;;  %p1000_p6 = por %p39_p4, %p38_p3 }
   0xc   : > { %p83_p7 = scmp.eq.s32.totalorder %s978_s13, 1  ;;  %p89_p8 = scmp.eq.s32.totalorder %s707_s14, 1 }
   0xd   : > { %p736_p10 = scmp.lt.s32.totalorder %s934_s12, 2  ;;  %s112_s23 = sand.u32 1, %s930_s11  }
   0xe   : > { %p1007_p11 = por %p83_p7, %p32_p0  ;;  %p1011_p12 = por %p89_p8, %p38_p3 }
   0xf   : > { %s722_s24 = sshll.u32 %s934_s12, 12  ;;  %s710_s25 = sshll.u32 %s112_s23, 8 }
  0x10   : > { %s1395_s21 = scalar_select %p1007_p11, 1, 0 }
  0x11   : > { %s1396_s22 = scalar_select %p1011_p12, 1, 0 }
  0x12   : > { %s1020_s28 = scalar_lea.hbm %s1389_s0, %s722_s24  ;;  %s116_s29 = scalar_lea.vmem [#allocation2], %s710_s25 }
  0x13   : > { %s123_s30 = sshll.u32 %s116_s29, 4  ;;  %p1024_p13 = pnand %p736_p10, %p996_p5  ;;  %s1028_s30 = int_to_ptr.vmem [resolvable:$true] %s123_s30 }
  0x14   : > { %s1030_s4 = scalar_lea.sflag [#allocation3], %s112_s23  ;;  %s838_s5 = scalar_lea.hbm %s1020_s28, 4096 }
  0x15   : > { %p839_p0 = scmp.ne.s32.totalorder %s1020_s28, %s838_s5  ;;  %p840_p1 = pneg %p1024_p13 }
  0x16   : > { %s843_s8 = scalar_lea.hbm %s1389_s0, 8192  ;;  %p844_p4 = scmp.lt.u32.totalorder %s1020_s28, %s1389_s0 }
  0x17   : > { %p841_p2 = pnand %p840_p1, %p839_p0  ;;  %p845_p5 = scmp.lt.u32.totalorder %s843_s8, %s838_s5 }
  0x18   : > { %p847_p8 = scmp.lt.u32.totalorder %s838_s5, %s1020_s28 }
  0x19   : > { %p842_p3 = pneg %p841_p2  ;;  %p846_p7 = por %p845_p5, %p844_p4 }
  0x1b   : > { %p848_p10 = por %p847_p8, %p846_p7 }
  0x1d   : > { %p849_p9 = pnand %p848_p10, %p842_p3 }
  0x1f   : > { %852 = shalt.err (!%p849_p9)
}
  0x20   : > { %s853_s17 = scalar_lea.vmem %s1028_s30, 4096  ;;  %s936_s19 = smov [#allocation2]  }
  0x21   : > { %p854_p0 = scmp.ne.s32.totalorder %s1028_s30, %s853_s17  ;;  %s858_s23 = sshll.u32 %s936_s19, 4  ;;  %s859_s23 = int_to_ptr.vmem [resolvable:$false] %s858_s23 }
  0x22   : > { %s860_s24 = scalar_lea.vmem %s859_s23, 8192  ;;  %p861_p11 = scmp.lt.s32.totalorder %s1028_s30, %s859_s23 }
  0x23   : > { %p856_p2 = pnand %p854_p0, %p840_p1  ;;  %p862_p4 = scmp.lt.s32.totalorder %s860_s24, %s853_s17 }
  0x25   : > { %p857_p12 = pneg %p856_p2  ;;  %p863_p5 = por %p862_p4, %p861_p11 }
  0x27   : > { %p864_p7 = pnand %p863_p5, %p857_p12 }
  0x29   : > { %867 = shalt.err (!%p864_p7)
}
  0x2a   : > { %s937_s25 = smov 128   ;;  %s938_s26 = smov 8  }
  0x2b   : > { %731 = dma.hbm_to_vmem [thread:$0]  (!%p1024_p13), %s1020_s28, 4096, %s1028_s30, %s1030_s4, %s937_s25, %s937_s25, %s938_s26  }
  0x2c   : > { %p713_p9 = scmp.ge.s32.totalorder %s934_s12, 1  ;;  %p131_p1 = scmp.lt.s32.totalorder %s934_s12, 3 }
  0x2e   : > { %p132_p3 = pnand %p713_p9, %p131_p1 }
  0x2f   : > { %s1061_s27 = sand.u32 (!%p132_p3), 1, %s926_s10  }
  0x30   : > { %135 = sbr.rel (%p132_p3) target bundleno = 445 (0x1bd), region = 28  ;;  %s714_s29 = sshll.u32 (!%p132_p3), %s1061_s27, 8 }
  0x31   : > { %s138_s5 = scalar_lea.sflag (!%p132_p3), [#allocation3], %s1061_s27  ;;  %s1067_s6 = scalar_lea.vmem (!%p132_p3), [#allocation2], %s714_s29 }
  0x37   : > { %913 = dma.done.wait (%p1000_p6), %s138_s5, 4096  }
  0x38   : > { %915 = vsyncadd (%p1000_p6), %s138_s5, 4294963200  ;;  %v1074_v0 = vld [vmem:[%s1067_s6] sm:$0xff]  ;;  %v1077_v1 = vld [vmem:[%s1067_s6 + $0x10] sm:$0xff]  ;;  %s1242_s30 = scalar_lea.vmem [#allocation5], %s714_s29  ;;  %s723_s3 = sshll.u32 %s978_s13, 12 }
  0x39   : > { %197 = vadd.xlane.f32.xlu0 %v1074_v0  ;;  %201 = vadd.xlane.f32.xlu1 %v1077_v1  ;;  %v1082_v2 = vld [vmem:[%s1067_s6 + $0x8] sm:$0xff]  ;;  %v1085_v3 = vld [vmem:[%s1067_s6 + $0x18] sm:$0xff]  ;;  %v1093_v5 = vld [vmem:[%s1067_s6 + $0x20] sm:$0xff]  ;;  %s634_s4 = sshll.u32 %s1242_s30, 4  ;;  %s1341_s14 = scalar_lea.hbm %s1391_s2, %s723_s3  ;;  %s1343_s4 = int_to_ptr.vmem [resolvable:$true] %s634_s4 }
  0x3a   : > { %v1090_v4 = vld [vmem:[%s1067_s6 + $0x28] sm:$0xff]  ;;  %v1098_v6 = vld [vmem:[%s1067_s6 + $0x38] sm:$0xff]  ;;  %v1101_v7 = vld [vmem:[%s1067_s6 + $0x30] sm:$0xff]  ;;  %s621_s13 = scalar_lea.sflag [#allocation4], %s1061_s27  ;;  %s868_s16 = scalar_lea.vmem %s1343_s4, 4096 }
  0x3b   : > { %v1106_v8 = vld [vmem:[%s1067_s6 + $0x48] sm:$0xff]  ;;  %v1109_v9 = vld [vmem:[%s1067_s6 + $0x40] sm:$0xff]  ;;  %v1114_v10 = vld [vmem:[%s1067_s6 + $0x58] sm:$0xff]  ;;  %p869_p6 = scmp.ne.s32.totalorder %s1343_s4, %s868_s16  ;;  %p1398_p11 = scmp.ne.s32.totalorder %s1395_s21, 0 }
  0x3c   : > { %v1117_v11 = vld [vmem:[%s1067_s6 + $0x50] sm:$0xff]  ;;  %v1122_v12 = vld [vmem:[%s1067_s6 + $0x68] sm:$0xff]  ;;  %v1125_v13 = vld [vmem:[%s1067_s6 + $0x60] sm:$0xff]  ;;  %s939_s17 = smov [#allocation5]  }
  0x3d   : > { %199 = vadd.xlane.f32.xlu0 %v1082_v2  ;;  %203 = vadd.xlane.f32.xlu1 %v1085_v3  ;;  %v1130_v14 = vld [vmem:[%s1067_s6 + $0x78] sm:$0xff]  ;;  %v1133_v15 = vld [vmem:[%s1067_s6 + $0x70] sm:$0xff]  ;;  %v1138_v16 = vld [vmem:[%s1067_s6 + $0x88] sm:$0xff]  ;;  %p870_p12 = pnand %p869_p6, %p1398_p11  ;;  %s872_s19 = sshll.u32 %s939_s17, 4  ;;  %s873_s19 = int_to_ptr.vmem [resolvable:$false] %s872_s19 }
  0x3e   : > { %v1141_v17 = vld [vmem:[%s1067_s6 + $0x80] sm:$0xff]  ;;  %v1146_v18 = vld [vmem:[%s1067_s6 + $0x98] sm:$0xff]  ;;  %v1149_v19 = vld [vmem:[%s1067_s6 + $0x90] sm:$0xff]  ;;  %s874_s23 = scalar_lea.vmem %s873_s19, 8192  ;;  %p875_p8 = scmp.lt.s32.totalorder %s1343_s4, %s873_s19 }
  0x3f   : > { %v1154_v20 = vld [vmem:[%s1067_s6 + $0xa8] sm:$0xff]  ;;  %v1157_v21 = vld [vmem:[%s1067_s6 + $0xa0] sm:$0xff]  ;;  %v1162_v22 = vld [vmem:[%s1067_s6 + $0xb8] sm:$0xff]  ;;  %p871_p13 = pneg %p870_p12  ;;  %p876_p10 = scmp.lt.s32.totalorder %s874_s23, %s868_s16 }
  0x40   : > { %v1165_v23 = vld [vmem:[%s1067_s6 + $0xb0] sm:$0xff]  ;;  %v1170_v24 = vld [vmem:[%s1067_s6 + $0xc8] sm:$0xff]  ;;  %v1173_v25 = vld [vmem:[%s1067_s6 + $0xc0] sm:$0xff] }
  0x41   : > { %207 = vadd.xlane.f32.xlu1 %v1090_v4  ;;  %205 = vadd.xlane.f32.xlu0 %v1093_v5  ;;  %v1178_v26 = vld [vmem:[%s1067_s6 + $0xd8] sm:$0xff]  ;;  %v1181_v27 = vld [vmem:[%s1067_s6 + $0xd0] sm:$0xff]  ;;  %v1186_v28 = vld [vmem:[%s1067_s6 + $0xe8] sm:$0xff]  ;;  %p877_p0 = por %p876_p10, %p875_p8 }
  0x42   : > { %v1189_v29 = vld [vmem:[%s1067_s6 + $0xe0] sm:$0xff]  ;;  %v1194_v30 = vld [vmem:[%s1067_s6 + $0xf8] sm:$0xff]  ;;  %v1197_v31 = vld [vmem:[%s1067_s6 + $0xf0] sm:$0xff] }
  0x43   : > { %p878_p2 = pnand %p877_p0, %p871_p13 }
  0x45   : > { %211 = vadd.xlane.f32.xlu1 %v1098_v6  ;;  %209 = vadd.xlane.f32.xlu0 %v1101_v7 }
  0x49   : > { %215 = vadd.xlane.f32.xlu1 %v1106_v8  ;;  %213 = vadd.xlane.f32.xlu0 %v1109_v9 }
  0x4d   : > { %219 = vadd.xlane.f32.xlu1 %v1114_v10  ;;  %217 = vadd.xlane.f32.xlu0 %v1117_v11 }
  0x51   : > { %223 = vadd.xlane.f32.xlu1 %v1122_v12  ;;  %221 = vadd.xlane.f32.xlu0 %v1125_v13 }
  0x55   : > { %227 = vadd.xlane.f32.xlu1 %v1130_v14  ;;  %225 = vadd.xlane.f32.xlu0 %v1133_v15 }
  0x59   : > { %231 = vadd.xlane.f32.xlu1 %v1138_v16  ;;  %229 = vadd.xlane.f32.xlu0 %v1141_v17 }
  0x5d   : > { %235 = vadd.xlane.f32.xlu1 %v1146_v18  ;;  %233 = vadd.xlane.f32.xlu0 %v1149_v19 }
  0x61   : > { %239 = vadd.xlane.f32.xlu1 %v1154_v20  ;;  %237 = vadd.xlane.f32.xlu0 %v1157_v21 }
  0x65   : > { %243 = vadd.xlane.f32.xlu1 %v1162_v22  ;;  %241 = vadd.xlane.f32.xlu0 %v1165_v23 }
  0x69   : > { %247 = vadd.xlane.f32.xlu1 %v1170_v24  ;;  %245 = vadd.xlane.f32.xlu0 %v1173_v25 }
  0x6d   : > { %251 = vadd.xlane.f32.xlu1 %v1178_v26  ;;  %249 = vadd.xlane.f32.xlu0 %v1181_v27 }
  0x71   : > { %255 = vadd.xlane.f32.xlu1 %v1186_v28  ;;  %253 = vadd.xlane.f32.xlu0 %v1189_v29 }
  0x75   : > { %259 = vadd.xlane.f32.xlu1 %v1194_v30  ;;  %257 = vadd.xlane.f32.xlu0 %v1197_v31 }
  0xc6   : > { %v198_v32 = vpop.xlane.xlu0 %197  ;;  %v202_v33 = vpop.xlane.xlu1 %201 }
  0xc7   : > { %v262_v34 = vmul.f32 0.0078125, %v198_v32  ;;  %v264_v35 = vmul.f32 0.0078125, %v202_v33 }
  0xc9   : > { %v294_v36 = vsub.f32 %v1074_v0, %v262_v34  ;;  %v296_v37 = vsub.f32 %v1077_v1, %v264_v35 }
  0xca   : > { %v200_v38 = vpop.xlane.xlu0 %199  ;;  %v204_v39 = vpop.xlane.xlu1 %203 }
  0xcb   : > { %v263_v40 = vmul.f32 0.0078125, %v200_v38  ;;  %v326_v41 = vmul.f32 %v294_v36, %v294_v36  ;;  %v265_v42 = vmul.f32 0.0078125, %v204_v39  ;;  %v328_v43 = vmul.f32 %v296_v37, %v296_v37 }
  0xcd   : > { %358 = vadd.xlane.f32.xlu0 %v326_v41  ;;  %v295_v44 = vsub.f32 %v1082_v2, %v263_v40  ;;  %v297_v45 = vsub.f32 %v1085_v3, %v265_v42 }
  0xce   : > { %v208_v46 = vpop.xlane.xlu1 %207  ;;  %v206_v47 = vpop.xlane.xlu0 %205 }
  0xcf   : > { %v327_v48 = vmul.f32 %v295_v44, %v295_v44  ;;  %v267_v49 = vmul.f32 0.0078125, %v208_v46  ;;  %v266_v50 = vmul.f32 0.0078125, %v206_v47  ;;  %v329_v51 = vmul.f32 %v297_v45, %v297_v45 }
  0xd1   : > { %362 = vadd.xlane.f32.xlu0 %v328_v43  ;;  %360 = vadd.xlane.f32.xlu1 %v327_v48  ;;  %v299_v52 = vsub.f32 %v1090_v4, %v267_v49  ;;  %v298_v53 = vsub.f32 %v1093_v5, %v266_v50 }
  0xd2   : > { %v212_v54 = vpop.xlane.xlu1 %211  ;;  %v210_v55 = vpop.xlane.xlu0 %209 }
  0xd3   : > { %v269_v56 = vmul.f32 0.0078125, %v212_v54  ;;  %v268_v57 = vmul.f32 0.0078125, %v210_v55  ;;  %v330_v58 = vmul.f32 %v298_v53, %v298_v53  ;;  %v331_v59 = vmul.f32 %v299_v52, %v299_v52 }
  0xd5   : > { %364 = vadd.xlane.f32.xlu1 %v329_v51  ;;  %366 = vadd.xlane.f32.xlu0 %v330_v58  ;;  %v301_v60 = vsub.f32 %v1098_v6, %v269_v56  ;;  %v300_v61 = vsub.f32 %v1101_v7, %v268_v57 }
  0xd6   : > { %v216_v62 = vpop.xlane.xlu1 %215  ;;  %v214_v63 = vpop.xlane.xlu0 %213 }
  0xd7   : > { %v271_v32 = vmul.f32 0.0078125, %v216_v62  ;;  %v270_v33 = vmul.f32 0.0078125, %v214_v63  ;;  %v332_v34 = vmul.f32 %v300_v61, %v300_v61  ;;  %v333_v35 = vmul.f32 %v301_v60, %v301_v60 }
  0xd9   : > { %368 = vadd.xlane.f32.xlu1 %v331_v59  ;;  %370 = vadd.xlane.f32.xlu0 %v332_v34  ;;  %v303_v36 = vsub.f32 %v1106_v8, %v271_v32  ;;  %v302_v37 = vsub.f32 %v1109_v9, %v270_v33 }
  0xda   : > { %v220_v38 = vpop.xlane.xlu1 %219  ;;  %v218_v39 = vpop.xlane.xlu0 %217 }
  0xdb   : > { %v273_v40 = vmul.f32 0.0078125, %v220_v38  ;;  %v272_v41 = vmul.f32 0.0078125, %v218_v39  ;;  %v334_v42 = vmul.f32 %v302_v37, %v302_v37  ;;  %v335_v43 = vmul.f32 %v303_v36, %v303_v36 }
  0xdd   : > { %372 = vadd.xlane.f32.xlu1 %v333_v35  ;;  %374 = vadd.xlane.f32.xlu0 %v334_v42  ;;  %v305_v44 = vsub.f32 %v1114_v10, %v273_v40  ;;  %v304_v45 = vsub.f32 %v1117_v11, %v272_v41 }
  0xde   : > { %v224_v46 = vpop.xlane.xlu1 %223  ;;  %v222_v47 = vpop.xlane.xlu0 %221 }
  0xdf   : > { %v275_v48 = vmul.f32 0.0078125, %v224_v46  ;;  %v274_v49 = vmul.f32 0.0078125, %v222_v47  ;;  %v336_v50 = vmul.f32 %v304_v45, %v304_v45  ;;  %v337_v51 = vmul.f32 %v305_v44, %v305_v44 }
  0xe1   : > { %376 = vadd.xlane.f32.xlu1 %v335_v43  ;;  %378 = vadd.xlane.f32.xlu0 %v336_v50  ;;  %v307_v52 = vsub.f32 %v1122_v12, %v275_v48  ;;  %v306_v53 = vsub.f32 %v1125_v13, %v274_v49 }
  0xe2   : > { %v228_v54 = vpop.xlane.xlu1 %227  ;;  %v226_v55 = vpop.xlane.xlu0 %225 }
  0xe3   : > { %v277_v56 = vmul.f32 0.0078125, %v228_v54  ;;  %v276_v57 = vmul.f32 0.0078125, %v226_v55  ;;  %v338_v58 = vmul.f32 %v306_v53, %v306_v53  ;;  %v339_v59 = vmul.f32 %v307_v52, %v307_v52 }
  0xe5   : > { %380 = vadd.xlane.f32.xlu1 %v337_v51  ;;  %382 = vadd.xlane.f32.xlu0 %v338_v58  ;;  %v309_v60 = vsub.f32 %v1130_v14, %v277_v56  ;;  %v308_v61 = vsub.f32 %v1133_v15, %v276_v57 }
  0xe6   : > { %v232_v62 = vpop.xlane.xlu1 %231  ;;  %v230_v63 = vpop.xlane.xlu0 %229 }
  0xe7   : > { %v279_v32 = vmul.f32 0.0078125, %v232_v62  ;;  %v278_v33 = vmul.f32 0.0078125, %v230_v63  ;;  %v340_v34 = vmul.f32 %v308_v61, %v308_v61  ;;  %v341_v35 = vmul.f32 %v309_v60, %v309_v60 }
  0xe9   : > { %384 = vadd.xlane.f32.xlu1 %v339_v59  ;;  %386 = vadd.xlane.f32.xlu0 %v340_v34  ;;  %v311_v36 = vsub.f32 %v1138_v16, %v279_v32  ;;  %v310_v37 = vsub.f32 %v1141_v17, %v278_v33 }
  0xea   : > { %v236_v38 = vpop.xlane.xlu1 %235  ;;  %v234_v39 = vpop.xlane.xlu0 %233 }
  0xeb   : > { %v281_v40 = vmul.f32 0.0078125, %v236_v38  ;;  %v280_v41 = vmul.f32 0.0078125, %v234_v39  ;;  %v342_v42 = vmul.f32 %v310_v37, %v310_v37  ;;  %v343_v43 = vmul.f32 %v311_v36, %v311_v36 }
  0xed   : > { %388 = vadd.xlane.f32.xlu1 %v341_v35  ;;  %390 = vadd.xlane.f32.xlu0 %v342_v42  ;;  %v313_v44 = vsub.f32 %v1146_v18, %v281_v40  ;;  %v312_v45 = vsub.f32 %v1149_v19, %v280_v41 }
  0xee   : > { %v240_v46 = vpop.xlane.xlu1 %239  ;;  %v238_v47 = vpop.xlane.xlu0 %237 }
  0xef   : > { %v283_v48 = vmul.f32 0.0078125, %v240_v46  ;;  %v282_v49 = vmul.f32 0.0078125, %v238_v47  ;;  %v344_v50 = vmul.f32 %v312_v45, %v312_v45  ;;  %v345_v51 = vmul.f32 %v313_v44, %v313_v44 }
  0xf1   : > { %392 = vadd.xlane.f32.xlu1 %v343_v43  ;;  %394 = vadd.xlane.f32.xlu0 %v344_v50  ;;  %v315_v52 = vsub.f32 %v1154_v20, %v283_v48  ;;  %v314_v53 = vsub.f32 %v1157_v21, %v282_v49 }
  0xf2   : > { %v244_v54 = vpop.xlane.xlu1 %243  ;;  %v242_v55 = vpop.xlane.xlu0 %241 }
  0xf3   : > { %v285_v56 = vmul.f32 0.0078125, %v244_v54  ;;  %v284_v57 = vmul.f32 0.0078125, %v242_v55  ;;  %v346_v58 = vmul.f32 %v314_v53, %v314_v53  ;;  %v347_v59 = vmul.f32 %v315_v52, %v315_v52 }
  0xf5   : > { %396 = vadd.xlane.f32.xlu1 %v345_v51  ;;  %398 = vadd.xlane.f32.xlu0 %v346_v58  ;;  %v317_v60 = vsub.f32 %v1162_v22, %v285_v56  ;;  %v316_v61 = vsub.f32 %v1165_v23, %v284_v57 }
  0xf6   : > { %v248_v62 = vpop.xlane.xlu1 %247  ;;  %v246_v63 = vpop.xlane.xlu0 %245 }
  0xf7   : > { %v287_v32 = vmul.f32 0.0078125, %v248_v62  ;;  %v286_v33 = vmul.f32 0.0078125, %v246_v63  ;;  %v348_v34 = vmul.f32 %v316_v61, %v316_v61  ;;  %v349_v35 = vmul.f32 %v317_v60, %v317_v60 }
  0xf9   : > { %400 = vadd.xlane.f32.xlu1 %v347_v59  ;;  %402 = vadd.xlane.f32.xlu0 %v348_v34  ;;  %v319_v36 = vsub.f32 %v1170_v24, %v287_v32  ;;  %v318_v37 = vsub.f32 %v1173_v25, %v286_v33 }
  0xfa   : > { %v252_v38 = vpop.xlane.xlu1 %251  ;;  %v250_v39 = vpop.xlane.xlu0 %249 }
  0xfb   : > { %v289_v40 = vmul.f32 0.0078125, %v252_v38  ;;  %v288_v41 = vmul.f32 0.0078125, %v250_v39  ;;  %v350_v42 = vmul.f32 %v318_v37, %v318_v37  ;;  %v351_v43 = vmul.f32 %v319_v36, %v319_v36 }
  0xfd   : > { %404 = vadd.xlane.f32.xlu1 %v349_v35  ;;  %406 = vadd.xlane.f32.xlu0 %v350_v42  ;;  %v321_v44 = vsub.f32 %v1178_v26, %v289_v40  ;;  %v320_v45 = vsub.f32 %v1181_v27, %v288_v41 }
  0xfe   : > { %v256_v46 = vpop.xlane.xlu1 %255  ;;  %v254_v47 = vpop.xlane.xlu0 %253 }
  0xff   : > { %v291_v48 = vmul.f32 0.0078125, %v256_v46  ;;  %v290_v49 = vmul.f32 0.0078125, %v254_v47  ;;  %v352_v50 = vmul.f32 %v320_v45, %v320_v45  ;;  %v353_v51 = vmul.f32 %v321_v44, %v321_v44 }
 0x101   : > { %408 = vadd.xlane.f32.xlu1 %v351_v43  ;;  %410 = vadd.xlane.f32.xlu0 %v352_v50  ;;  %v323_v52 = vsub.f32 %v1186_v28, %v291_v48  ;;  %v322_v53 = vsub.f32 %v1189_v29, %v290_v49 }
 0x102   : > { %v260_v54 = vpop.xlane.xlu1 %259  ;;  %v258_v55 = vpop.xlane.xlu0 %257 }
 0x103   : > { %v293_v56 = vmul.f32 0.0078125, %v260_v54  ;;  %v292_v57 = vmul.f32 0.0078125, %v258_v55  ;;  %v354_v58 = vmul.f32 %v322_v53, %v322_v53  ;;  %v355_v59 = vmul.f32 %v323_v52, %v323_v52  ;;  %v1236_v52 = vld [vmem:[%s1390_s1] ss:$0 sm:$0xff] }
 0x105   : > { %412 = vadd.xlane.f32.xlu1 %v353_v51  ;;  %414 = vadd.xlane.f32.xlu0 %v354_v58  ;;  %v325_v60 = vsub.f32 %v1194_v30, %v293_v56  ;;  %v324_v61 = vsub.f32 %v1197_v31, %v292_v57 }
 0x107   : > { %v356_v62 = vmul.f32 %v324_v61, %v324_v61  ;;  %v357_v63 = vmul.f32 %v325_v60, %v325_v60 }
 0x109   : > { %416 = vadd.xlane.f32.xlu1 %v355_v59  ;;  %418 = vadd.xlane.f32.xlu0 %v356_v62 }
 0x10d   : > { %420 = vadd.xlane.f32.xlu1 %v357_v63 }
 0x15a   : > { %v359_v32 = vpop.xlane.xlu0 %358 }
 0x15b   : > { %v422_v33 = vmul.f32 0.0078125, %v359_v32 }
 0x15d   : > { %v454_v34 = vadd.f32 1e-05, %v422_v33 }
 0x15e   : > { %v361_v35 = vpop.xlane.xlu1 %360  ;;  %v363_v36 = vpop.xlane.xlu0 %362 }
 0x15f   : > { %774 = vrsqrt.f32 %v454_v34  ;;  %v423_v37 = vmul.f32 0.0078125, %v361_v35  ;;  %v424_v38 = vmul.f32 0.0078125, %v363_v36 }
 0x161   : > { %v455_v39 = vadd.f32 1e-05, %v423_v37  ;;  %v456_v40 = vadd.f32 1e-05, %v424_v38 }
 0x162   : > { %v365_v41 = vpop.xlane.xlu1 %364  ;;  %v367_v42 = vpop.xlane.xlu0 %366 }
 0x163   : > { %776 = vrsqrt.f32 %v455_v39  ;;  %v425_v43 = vmul.f32 0.0078125, %v365_v41  ;;  %v426_v44 = vmul.f32 0.0078125, %v367_v42 }
 0x164   : > { %778 = vrsqrt.f32 %v456_v40 }
 0x165   : > { %v457_v45 = vadd.f32 1e-05, %v425_v43  ;;  %v458_v46 = vadd.f32 1e-05, %v426_v44 }
 0x166   : > { %v369_v47 = vpop.xlane.xlu1 %368  ;;  %v371_v48 = vpop.xlane.xlu0 %370 }
 0x167   : > { %780 = vrsqrt.f32 %v457_v45  ;;  %v427_v49 = vmul.f32 0.0078125, %v369_v47  ;;  %v428_v50 = vmul.f32 0.0078125, %v371_v48 }
 0x168   : > { %782 = vrsqrt.f32 %v458_v46 }
 0x169   : > { %v775_v51 = vpop.eup %774  ;;  %v459_v53 = vadd.f32 1e-05, %v427_v49  ;;  %v460_v54 = vadd.f32 1e-05, %v428_v50 }
 0x16a   : > { %v518_v55 = vmul.f32 %v775_v51, %v1074_v0  ;;  %v373_v56 = vpop.xlane.xlu1 %372  ;;  %v375_v57 = vpop.xlane.xlu0 %374 }
 0x16b   : > { %784 = vrsqrt.f32 %v459_v53  ;;  %v429_v58 = vmul.f32 0.0078125, %v373_v56  ;;  %v430_v59 = vmul.f32 0.0078125, %v375_v57 }
 0x16c   : > { %v556_v60 = vmul.f32 %v1236_v52, %v518_v55  ;;  %786 = vrsqrt.f32 %v460_v54 }
 0x16d   : > { %v777_v61 = vpop.eup %776  ;;  %v461_v62 = vadd.f32 1e-05, %v429_v58  ;;  %v462_v63 = vadd.f32 1e-05, %v430_v59 }
 0x16e   : > { %v779_v32 = vpop.eup %778  ;;  %588 = vst [vmem:[%s1242_s30] sm:$0xff] %v556_v60  ;;  %v519_v0 = vmul.f32 %v777_v61, %v1082_v2  ;;  %v377_v33 = vpop.xlane.xlu1 %376 }
 0x16f   : > { %v379_v34 = vpop.xlane.xlu0 %378  ;;  %v520_v35 = vmul.f32 %v779_v32, %v1077_v1  ;;  %788 = vrsqrt.f32 %v461_v62  ;;  %v431_v36 = vmul.f32 0.0078125, %v377_v33 }
 0x170   : > { %v432_v37 = vmul.f32 0.0078125, %v379_v34  ;;  %v557_v38 = vmul.f32 %v1236_v52, %v519_v0  ;;  %790 = vrsqrt.f32 %v462_v63 }
 0x171   : > { %v781_v39 = vpop.eup %780  ;;  %v558_v40 = vmul.f32 %v1236_v52, %v520_v35  ;;  %v463_v41 = vadd.f32 1e-05, %v431_v36 }
 0x172   : > { %v464_v42 = vadd.f32 1e-05, %v432_v37  ;;  %v783_v43 = vpop.eup %782  ;;  %589 = vst [vmem:[%s1242_s30 + $0x8] sm:$0xff] %v557_v38  ;;  %v521_v2 = vmul.f32 %v781_v39, %v1085_v3  ;;  %v381_v44 = vpop.xlane.xlu1 %380 }
 0x173   : > { %v383_v45 = vpop.xlane.xlu0 %382  ;;  %590 = vst [vmem:[%s1242_s30 + $0x10] sm:$0xff] %v558_v40  ;;  %v522_v1 = vmul.f32 %v783_v43, %v1093_v5  ;;  %792 = vrsqrt.f32 %v463_v41  ;;  %v433_v46 = vmul.f32 0.0078125, %v381_v44 }
 0x174   : > { %v434_v47 = vmul.f32 0.0078125, %v383_v45  ;;  %v559_v48 = vmul.f32 %v1236_v52, %v521_v2  ;;  %794 = vrsqrt.f32 %v464_v42 }
 0x175   : > { %v785_v49 = vpop.eup %784  ;;  %v560_v50 = vmul.f32 %v1236_v52, %v522_v1  ;;  %v465_v51 = vadd.f32 1e-05, %v433_v46 }
 0x176   : > { %v466_v53 = vadd.f32 1e-05, %v434_v47  ;;  %v787_v54 = vpop.eup %786  ;;  %591 = vst [vmem:[%s1242_s30 + $0x18] sm:$0xff] %v559_v48  ;;  %v523_v3 = vmul.f32 %v785_v49, %v1090_v4  ;;  %v385_v55 = vpop.xlane.xlu1 %384 }
 0x177   : > { %v387_v56 = vpop.xlane.xlu0 %386  ;;  %592 = vst [vmem:[%s1242_s30 + $0x20] sm:$0xff] %v560_v50  ;;  %v524_v5 = vmul.f32 %v787_v54, %v1101_v7  ;;  %796 = vrsqrt.f32 %v465_v51  ;;  %v435_v57 = vmul.f32 0.0078125, %v385_v55 }
 0x178   : > { %v436_v58 = vmul.f32 0.0078125, %v387_v56  ;;  %v561_v59 = vmul.f32 %v1236_v52, %v523_v3  ;;  %798 = vrsqrt.f32 %v466_v53 }
 0x179   : > { %v789_v60 = vpop.eup %788  ;;  %v562_v61 = vmul.f32 %v1236_v52, %v524_v5  ;;  %v467_v62 = vadd.f32 1e-05, %v435_v57 }
 0x17a   : > { %v468_v63 = vadd.f32 1e-05, %v436_v58  ;;  %v791_v32 = vpop.eup %790  ;;  %593 = vst [vmem:[%s1242_s30 + $0x28] sm:$0xff] %v561_v59  ;;  %v525_v4 = vmul.f32 %v789_v60, %v1098_v6  ;;  %v389_v0 = vpop.xlane.xlu1 %388 }
 0x17b   : > { %v391_v33 = vpop.xlane.xlu0 %390  ;;  %594 = vst [vmem:[%s1242_s30 + $0x30] sm:$0xff] %v562_v61  ;;  %v526_v7 = vmul.f32 %v791_v32, %v1109_v9  ;;  %800 = vrsqrt.f32 %v467_v62  ;;  %v437_v34 = vmul.f32 0.0078125, %v389_v0 }
 0x17c   : > { %v438_v35 = vmul.f32 0.0078125, %v391_v33  ;;  %v563_v36 = vmul.f32 %v1236_v52, %v525_v4  ;;  %802 = vrsqrt.f32 %v468_v63 }
 0x17d   : > { %v793_v37 = vpop.eup %792  ;;  %v564_v38 = vmul.f32 %v1236_v52, %v526_v7  ;;  %v469_v39 = vadd.f32 1e-05, %v437_v34 }
 0x17e   : > { %v470_v40 = vadd.f32 1e-05, %v438_v35  ;;  %v795_v41 = vpop.eup %794  ;;  %595 = vst [vmem:[%s1242_s30 + $0x38] sm:$0xff] %v563_v36  ;;  %v527_v6 = vmul.f32 %v793_v37, %v1106_v8  ;;  %v393_v42 = vpop.xlane.xlu1 %392 }
 0x17f   : > { %v395_v43 = vpop.xlane.xlu0 %394  ;;  %596 = vst [vmem:[%s1242_s30 + $0x40] sm:$0xff] %v564_v38  ;;  %v528_v9 = vmul.f32 %v795_v41, %v1117_v11  ;;  %804 = vrsqrt.f32 %v469_v39  ;;  %v439_v2 = vmul.f32 0.0078125, %v393_v42 }
 0x180   : > { %v440_v44 = vmul.f32 0.0078125, %v395_v43  ;;  %v565_v45 = vmul.f32 %v1236_v52, %v527_v6  ;;  %806 = vrsqrt.f32 %v470_v40 }
 0x181   : > { %v797_v1 = vpop.eup %796  ;;  %v566_v46 = vmul.f32 %v1236_v52, %v528_v9  ;;  %v471_v47 = vadd.f32 1e-05, %v439_v2 }
 0x182   : > { %v472_v48 = vadd.f32 1e-05, %v440_v44  ;;  %v799_v49 = vpop.eup %798  ;;  %597 = vst [vmem:[%s1242_s30 + $0x48] sm:$0xff] %v565_v45  ;;  %v529_v8 = vmul.f32 %v797_v1, %v1114_v10  ;;  %v397_v50 = vpop.xlane.xlu1 %396 }
 0x183   : > { %v399_v51 = vpop.xlane.xlu0 %398  ;;  %598 = vst [vmem:[%s1242_s30 + $0x50] sm:$0xff] %v566_v46  ;;  %v530_v11 = vmul.f32 %v799_v49, %v1125_v13  ;;  %808 = vrsqrt.f32 %v471_v47  ;;  %v441_v53 = vmul.f32 0.0078125, %v397_v50 }
 0x184   : > { %v442_v54 = vmul.f32 0.0078125, %v399_v51  ;;  %v567_v3 = vmul.f32 %v1236_v52, %v529_v8  ;;  %810 = vrsqrt.f32 %v472_v48 }
 0x185   : > { %v801_v55 = vpop.eup %800  ;;  %v568_v56 = vmul.f32 %v1236_v52, %v530_v11  ;;  %v473_v5 = vadd.f32 1e-05, %v441_v53 }
 0x186   : > { %v474_v57 = vadd.f32 1e-05, %v442_v54  ;;  %v803_v58 = vpop.eup %802  ;;  %599 = vst [vmem:[%s1242_s30 + $0x58] sm:$0xff] %v567_v3  ;;  %v531_v10 = vmul.f32 %v801_v55, %v1122_v12  ;;  %v401_v59 = vpop.xlane.xlu1 %400 }
 0x187   : > { %v403_v60 = vpop.xlane.xlu0 %402  ;;  %600 = vst [vmem:[%s1242_s30 + $0x60] sm:$0xff] %v568_v56  ;;  %v532_v13 = vmul.f32 %v803_v58, %v1133_v15  ;;  %812 = vrsqrt.f32 %v473_v5  ;;  %v443_v61 = vmul.f32 0.0078125, %v401_v59 }
 0x188   : > { %v444_v62 = vmul.f32 0.0078125, %v403_v60  ;;  %v569_v63 = vmul.f32 %v1236_v52, %v531_v10  ;;  %814 = vrsqrt.f32 %v474_v57 }
 0x189   : > { %v805_v32 = vpop.eup %804  ;;  %v570_v4 = vmul.f32 %v1236_v52, %v532_v13  ;;  %v475_v0 = vadd.f32 1e-05, %v443_v61 }
 0x18a   : > { %v476_v33 = vadd.f32 1e-05, %v444_v62  ;;  %v807_v7 = vpop.eup %806  ;;  %601 = vst [vmem:[%s1242_s30 + $0x68] sm:$0xff] %v569_v63  ;;  %v533_v12 = vmul.f32 %v805_v32, %v1130_v14  ;;  %v405_v34 = vpop.xlane.xlu1 %404 }
 0x18b   : > { %v407_v35 = vpop.xlane.xlu0 %406  ;;  %602 = vst [vmem:[%s1242_s30 + $0x70] sm:$0xff] %v570_v4  ;;  %v534_v15 = vmul.f32 %v807_v7, %v1141_v17  ;;  %816 = vrsqrt.f32 %v475_v0  ;;  %v445_v36 = vmul.f32 0.0078125, %v405_v34 }
 0x18c   : > { %v446_v37 = vmul.f32 0.0078125, %v407_v35  ;;  %v571_v38 = vmul.f32 %v1236_v52, %v533_v12  ;;  %818 = vrsqrt.f32 %v476_v33 }
 0x18d   : > { %v809_v39 = vpop.eup %808  ;;  %v572_v40 = vmul.f32 %v1236_v52, %v534_v15  ;;  %v477_v41 = vadd.f32 1e-05, %v445_v36 }
 0x18e   : > { %v478_v6 = vadd.f32 1e-05, %v446_v37  ;;  %v811_v42 = vpop.eup %810  ;;  %603 = vst [vmem:[%s1242_s30 + $0x78] sm:$0xff] %v571_v38  ;;  %v535_v14 = vmul.f32 %v809_v39, %v1138_v16  ;;  %v409_v43 = vpop.xlane.xlu1 %408 }
 0x18f   : > { %v411_v9 = vpop.xlane.xlu0 %410  ;;  %604 = vst [vmem:[%s1242_s30 + $0x80] sm:$0xff] %v572_v40  ;;  %v536_v17 = vmul.f32 %v811_v42, %v1149_v19  ;;  %820 = vrsqrt.f32 %v477_v41  ;;  %v447_v2 = vmul.f32 0.0078125, %v409_v43 }
 0x190   : > { %v448_v44 = vmul.f32 0.0078125, %v411_v9  ;;  %v573_v45 = vmul.f32 %v1236_v52, %v535_v14  ;;  %822 = vrsqrt.f32 %v478_v6 }
 0x191   : > { %v813_v1 = vpop.eup %812  ;;  %v574_v46 = vmul.f32 %v1236_v52, %v536_v17  ;;  %v479_v47 = vadd.f32 1e-05, %v447_v2 }
 0x192   : > { %v480_v48 = vadd.f32 1e-05, %v448_v44  ;;  %v815_v49 = vpop.eup %814  ;;  %605 = vst [vmem:[%s1242_s30 + $0x88] sm:$0xff] %v573_v45  ;;  %v537_v16 = vmul.f32 %v813_v1, %v1146_v18  ;;  %v413_v8 = vpop.xlane.xlu1 %412 }
 0x193   : > { %v415_v50 = vpop.xlane.xlu0 %414  ;;  %606 = vst [vmem:[%s1242_s30 + $0x90] sm:$0xff] %v574_v46  ;;  %v538_v19 = vmul.f32 %v815_v49, %v1157_v21  ;;  %824 = vrsqrt.f32 %v479_v47  ;;  %v449_v51 = vmul.f32 0.0078125, %v413_v8 }
 0x194   : > { %v450_v11 = vmul.f32 0.0078125, %v415_v50  ;;  %v575_v53 = vmul.f32 %v1236_v52, %v537_v16  ;;  %826 = vrsqrt.f32 %v480_v48 }
 0x195   : > { %v817_v54 = vpop.eup %816  ;;  %v576_v3 = vmul.f32 %v1236_v52, %v538_v19  ;;  %v481_v55 = vadd.f32 1e-05, %v449_v51 }
 0x196   : > { %v482_v56 = vadd.f32 1e-05, %v450_v11  ;;  %v819_v5 = vpop.eup %818  ;;  %607 = vst [vmem:[%s1242_s30 + $0x98] sm:$0xff] %v575_v53  ;;  %v539_v18 = vmul.f32 %v817_v54, %v1154_v20  ;;  %v417_v57 = vpop.xlane.xlu1 %416 }
 0x197   : > { %v419_v58 = vpop.xlane.xlu0 %418  ;;  %608 = vst [vmem:[%s1242_s30 + $0xa0] sm:$0xff] %v576_v3  ;;  %v540_v21 = vmul.f32 %v819_v5, %v1165_v23  ;;  %828 = vrsqrt.f32 %v481_v55  ;;  %v451_v10 = vmul.f32 0.0078125, %v417_v57 }
 0x198   : > { %v452_v59 = vmul.f32 0.0078125, %v419_v58  ;;  %v577_v60 = vmul.f32 %v1236_v52, %v539_v18  ;;  %830 = vrsqrt.f32 %v482_v56 }
 0x199   : > { %v821_v13 = vpop.eup %820  ;;  %v578_v61 = vmul.f32 %v1236_v52, %v540_v21  ;;  %v483_v62 = vadd.f32 1e-05, %v451_v10 }
 0x19a   : > { %v484_v63 = vadd.f32 1e-05, %v452_v59  ;;  %v823_v32 = vpop.eup %822  ;;  %609 = vst [vmem:[%s1242_s30 + $0xa8] sm:$0xff] %v577_v60  ;;  %v541_v20 = vmul.f32 %v821_v13, %v1162_v22  ;;  %v421_v4 = vpop.xlane.xlu1 %420 }
 0x19b   : > { %610 = vst [vmem:[%s1242_s30 + $0xb0] sm:$0xff] %v578_v61  ;;  %v542_v23 = vmul.f32 %v823_v32, %v1173_v25  ;;  %832 = vrsqrt.f32 %v483_v62  ;;  %v453_v0 = vmul.f32 0.0078125, %v421_v4 }
 0x19c   : > { %v579_v33 = vmul.f32 %v1236_v52, %v541_v20  ;;  %834 = vrsqrt.f32 %v484_v63 }
 0x19d   : > { %v825_v7 = vpop.eup %824  ;;  %v580_v12 = vmul.f32 %v1236_v52, %v542_v23  ;;  %v485_v34 = vadd.f32 1e-05, %v453_v0 }
 0x19e   : > { %v827_v35 = vpop.eup %826  ;;  %611 = vst [vmem:[%s1242_s30 + $0xb8] sm:$0xff] %v579_v33  ;;  %v543_v15 = vmul.f32 %v825_v7, %v1170_v24 }
 0x19f   : > { %612 = vst [vmem:[%s1242_s30 + $0xc0] sm:$0xff] %v580_v12  ;;  %v544_v22 = vmul.f32 %v827_v35, %v1181_v27  ;;  %836 = vrsqrt.f32 %v485_v34 }
 0x1a0   : > { %v581_v25 = vmul.f32 %v1236_v52, %v543_v15 }
 0x1a1   : > { %v829_v36 = vpop.eup %828  ;;  %v582_v37 = vmul.f32 %v1236_v52, %v544_v22 }
 0x1a2   : > { %v831_v38 = vpop.eup %830  ;;  %613 = vst [vmem:[%s1242_s30 + $0xc8] sm:$0xff] %v581_v25  ;;  %v545_v39 = vmul.f32 %v829_v36, %v1178_v26 }
 0x1a3   : > { %614 = vst [vmem:[%s1242_s30 + $0xd0] sm:$0xff] %v582_v37  ;;  %v546_v24 = vmul.f32 %v831_v38, %v1189_v29 }
 0x1a4   : > { %v583_v27 = vmul.f32 %v1236_v52, %v545_v39 }
 0x1a5   : > { %v833_v40 = vpop.eup %832  ;;  %v584_v41 = vmul.f32 %v1236_v52, %v546_v24 }
 0x1a6   : > { %v835_v6 = vpop.eup %834  ;;  %615 = vst [vmem:[%s1242_s30 + $0xd8] sm:$0xff] %v583_v27  ;;  %v547_v42 = vmul.f32 %v833_v40, %v1186_v28 }
 0x1a7   : > { %616 = vst [vmem:[%s1242_s30 + $0xe0] sm:$0xff] %v584_v41  ;;  %v548_v14 = vmul.f32 %v835_v6, %v1197_v31 }
 0x1a8   : > { %v585_v26 = vmul.f32 %v1236_v52, %v547_v42 }
 0x1a9   : > { %v837_v29 = vpop.eup %836  ;;  %v586_v43 = vmul.f32 %v1236_v52, %v548_v14 }
 0x1aa   : > { %617 = vst [vmem:[%s1242_s30 + $0xe8] sm:$0xff] %v585_v26  ;;  %v549_v9 = vmul.f32 %v837_v29, %v1194_v30 }
 0x1ab   : > { %618 = vst [vmem:[%s1242_s30 + $0xf0] sm:$0xff] %v586_v43 }
 0x1ac   : > { %v587_v28 = vmul.f32 %v1236_v52, %v549_v9 }
 0x1ae   : > { %619 = vst [vmem:[%s1242_s30 + $0xf8] sm:$0xff] %v587_v28 }
 0x1af   : > { %881 = shalt.err (!%p878_p2)
}
 0x1b0   : > { %s882_s24 = scalar_lea.hbm %s1341_s14, 4096  ;;  %s886_s29 = scalar_lea.hbm %s1391_s2, 8192 }
 0x1b1   : > { %p883_p4 = scmp.ne.s32.totalorder %s1341_s14, %s882_s24  ;;  %p887_p9 = scmp.lt.u32.totalorder %s1341_s14, %s1391_s2 }
 0x1b2   : > { %p888_p1 = scmp.lt.u32.totalorder %s886_s29, %s882_s24  ;;  %p890_p6 = scmp.lt.u32.totalorder %s882_s24, %s1341_s14 }
 0x1b3   : > { %p884_p5 = pnand %p883_p4, %p1398_p11 }
 0x1b4   : > { %p889_p3 = por %p888_p1, %p887_p9 }
 0x1b5   : > { %p885_p7 = pneg %p884_p5 }
 0x1b6   : > { %p891_p12 = por %p890_p6, %p889_p3 }
 0x1b8   : > { %p892_p13 = pnand %p891_p12, %p885_p7 }
 0x1ba   : > { %895 = shalt.err (!%p892_p13)
}
 0x1bb   : > { %s940_s20 = smov 128   ;;  %s941_s28 = smov 8  }
 0x1bc   : > { %726 = dma.vmem_to_hbm [thread:$0]  (%p1398_p11), %s1343_s4, 4096, %s1341_s14, %s621_s13, %s940_s20, %s940_s20, %s941_s28  }
 0x1bd PF: > { %s649_s30 = sand.u32 1, %s922_s9   ;;  %p1399_p8 = scmp.ne.s32.totalorder %s1396_s22, 0 }
 0x1be   : > { %p1400_p10 = scmp.ge.s32.totalorder %s934_s12, 2  ;;  %s650_s3 = scalar_lea.sflag [#allocation4], %s649_s30 }
 0x1c0   : > { %p733_p0 = pnand %p1400_p10, %p1399_p8 }
 0x1c2   : > { %917 = dma.done.wait (!%p733_p0), %s650_s3, 4096  }
 0x1c3   : > { %919 = vsyncadd (!%p733_p0), %s650_s3, 4294963200  ;;  %p15_p2 = scmp.ge.s32.totalorder %s982_s15, 4   ;;  %s1401_s9 = smov %s926_s10 }
 0x1c4   : > { %s1402_s10 = smov %s930_s11  ;;  %s1403_s11 = smov %s994_s18 }
 0x1c5   : > { %s1404_s12 = smov %s982_s15  ;;  %17 = sbr.rel (!%p15_p2) target bundleno = 5 (0x5), region = 73 }
 0x1cc   :  { %655 = vsyncpa [#allocation3], 1 }
 0x1cd   :  { %657 = vsyncpa [#allocation3 + $0x1], 1 }
 0x1ce   :  { %658 = vsyncpa [#allocation4], 1 }
 0x1cf   :  { %660 = vsyncpa [#allocation4 + $0x1], 1 }

</bundles_post_ra>
